<compile_context>
chip_gen: v7x
topology: tpu7x:2x2x1
jax: 0.10.0
libtpu: 0.0.40
codegen_flags: <defaults>
</compile_context>

<pallas_src>
import numpy as np

import jax
import jax.numpy as jnp
from jax.experimental import pallas as pl
from jax.experimental.pallas import tpu as pltpu


# ----------------------------------------------------------------------------
# Fused depthwise MixConv kernel.
# ----------------------------------------------------------------------------
def _make_mixconv_kernel(ks_max, Nb, H, WC):
    p = ks_max // 2

    def kernel(x_ref, w_ref, b_ref, o_ref, pad_ref):
        # x_ref  : (Nb, H, WC)        activations, channels minor (lane-dense)
        # w_ref  : (ks_max, WC, WC)   banded per-row weight matrices
        # b_ref  : (1, WC)            per-channel bias, tiled along W
        # o_ref  : (Nb, H, WC)        output
        # pad_ref: (Nb, H + 2p, WC)   VMEM scratch, vertical 'same' halo only

        # Zero ONLY the vertical halo rows; the interior is overwritten next.
        if p > 0:
            pad_ref[:, :p, :] = jnp.zeros((Nb, p, WC), pad_ref.dtype)
            pad_ref[:, p + H:, :] = jnp.zeros((Nb, p, WC), pad_ref.dtype)
        # Lane-aligned interior copy (full WC lanes, lane offset 0).
        pad_ref[:, p:p + H, :] = x_ref[...]

        # Bias folded into the accumulator init; broadcast hoisted out of the
        # loops (done once per kernel invocation).
        bias = jnp.broadcast_to(b_ref[...], (H, WC)).astype(jnp.float32)

        for b in range(Nb):                 # static unroll, Nb is small
            acc = bias
            for kh in range(ks_max):        # ks_max MXU matmuls, f32 accumulate
                acc = acc + jnp.dot(pad_ref[b, kh:kh + H, :], w_ref[kh],
                                    preferred_element_type=jnp.float32)
            o_ref[b] = acc.astype(o_ref.dtype)

    return kernel


def _pick_batch_block(N, per_elem_bytes, budget_bytes=8 << 20):
    """Largest divisor of N whose double-buffered in+out blocks fit a budget
    comfortably below the scoped-VMEM default (32 MiB on v6e/v7x)."""
    nb = max(1, min(N, budget_bytes // max(per_elem_bytes, 1)))
    while N % nb:
        nb -= 1
    return nb


def mixconv_fused_pallas(x_flat, bands, b_flat, ks_max, H, W, C):
    """x_flat: (N, H, W*C), bands: (ks_max, W*C, W*C), b_flat: (1, W*C) f32."""
    N = x_flat.shape[0]
    WC = W * C
    p = ks_max // 2
    Hp = H + 2 * p
    io_dtype = x_flat.dtype
    itemsize = jnp.dtype(io_dtype).itemsize

    # Double-buffered input + output blocks per batch element.
    Nb = _pick_batch_block(N, 4 * H * WC * itemsize)
    steps = N // Nb

    kernel = _make_mixconv_kernel(ks_max, Nb, H, WC)

    return pl.pallas_call(
        kernel,
        out_shape=jax.ShapeDtypeStruct((N, H, WC), io_dtype),
        grid=(steps,),
        in_specs=[
            pl.BlockSpec((Nb, H, WC), lambda n: (n, 0, 0)),
            # Constant-index weight/bias blocks: same block every step, so
            # they are not re-DMA'd per step.
            pl.BlockSpec((ks_max, WC, WC), lambda n: (0, 0, 0)),
            pl.BlockSpec((1, WC), lambda n: (0, 0)),
        ],
        out_specs=pl.BlockSpec((Nb, H, WC), lambda n: (n, 0, 0)),
        scratch_shapes=[pltpu.VMEM((Nb, Hp, WC), io_dtype)],
        compiler_params=pltpu.CompilerParams(
            dimension_semantics=("parallel",) if steps > 1 else ("arbitrary",)),
    )(x_flat, bands, b_flat)


# ----------------------------------------------------------------------------
# Parameter setup + layout plumbing (plain JAX, done once).
# ----------------------------------------------------------------------------
def split_groups(num_channels, num_groups):
    counts = [num_channels // num_groups] * num_groups
    counts[0] += num_channels - sum(counts)
    return counts


def _bf16_exact(a):
    # Snap test parameters/data onto the bf16 grid so the correctness check is
    # independent of the MXU input-rounding policy for f32 matmuls (DEFAULT
    # precision may demote operands to bf16). The kernel logic (band
    # construction, padding, channel ordering, bias) is still checked exactly.
    return a.astype(jnp.bfloat16).astype(jnp.float32)


def init_mixconv_params(key, in_channels, out_channels, kernel_sizes):
    """Deterministic init. Depthwise Conv2d weights: (oc, 1, ks, ks), bias: (oc,)."""
    ic_counts = split_groups(in_channels, len(kernel_sizes))
    oc_counts = split_groups(out_channels, len(kernel_sizes))
    params = []
    for ic, oc, ks in zip(ic_counts, oc_counts, kernel_sizes):
        assert ic == oc, "depthwise path assumes ic == oc per group"
        assert ks % 2 == 1, "padding = ks // 2 ('same') assumes odd kernel size"
        key, kw, kb = jax.random.split(key, 3)
        fan_in = 1 * ks * ks  # groups == ic => 1 input channel per filter
        bound = 1.0 / (fan_in ** 0.5)
        w = jax.random.uniform(kw, (oc, 1, ks, ks), jnp.float32, -bound, bound)
        b = jax.random.uniform(kb, (oc,), jnp.float32, -bound, bound)
        params.append(dict(ic=ic, oc=oc, ks=ks, w=_bf16_exact(w), b=_bf16_exact(b)))
    return params


def _fuse_filters(params, ks_max):
    """Center-pad every group's (ks,ks) filter to ks_max and concatenate along
    channels -> per-channel (ks_max, ks_max, C) bank. Exactly equivalent to
    running each group with its own smaller 'same' padding."""
    w_parts, b_parts = [], []
    for g in params:
        ks = g["ks"]
        off = (ks_max - ks) // 2
        wg = jnp.transpose(g["w"][:, 0], (1, 2, 0))            # (ks, ks, oc)
        wg = jnp.pad(wg, ((off, off), (off, off), (0, 0)))     # (ks_max, ks_max, oc)
        w_parts.append(wg)
        b_parts.append(g["b"])
    return jnp.concatenate(w_parts, -1), jnp.concatenate(b_parts, -1)


def _build_band_matrices(w_fused, W, C, ks_max):
    """bands[kh] is a (W*C, W*C) matrix s.t. row_of_vertically_padded_input @
    bands[kh] applies, for every output column wout and channel c, the taps
    w_fused[kh, :, c] with horizontal 'same' padding (out-of-range taps are
    dropped == zero padding)."""
    p = ks_max // 2
    # sel[kw, win, wout] = 1 iff win == wout + kw - p and 0 <= win < W (static).
    sel = np.zeros((ks_max, W, W), np.float32)
    for kw in range(ks_max):
        for wout in range(W):
            win = wout + kw - p
            if 0 <= win < W:
                sel[kw, win, wout] = 1.0
    eye_c = np.eye(C, dtype=np.float32)
    # bands[kh, win, c_in, wout, c_out] = sum_kw sel * w_fused[kh,kw,c] * I[c_in,c_out]
    bands = jnp.einsum("kab,hkc,cd->hacbd", sel, w_fused, eye_c)
    return bands.reshape(ks_max, W * C, W * C)


def mixconv_forward_nhwc(x_nhwc, params, io_dtype=None):
    """Channels-minor entry point (preferred: no transposes needed)."""
    N, H, W, C = x_nhwc.shape
    if io_dtype is None:
        io_dtype = x_nhwc.dtype
    ks_max = max(g["ks"] for g in params)

    w_fused, b_fused = _fuse_filters(params, ks_max)        # (ks,ks,C), (C,)
    bands = _build_band_matrices(w_fused, W, C, ks_max)     # (ks_max, WC, WC)
    WC = W * C

    x_flat = x_nhwc.reshape(N, H, WC).astype(io_dtype)
    bands = bands.astype(io_dtype)
    # Bias stays f32: it is added into the f32 accumulator inside the kernel.
    b_flat = jnp.tile(b_fused, W).reshape(1, WC).astype(jnp.float32)

    out_flat = mixconv_fused_pallas(x_flat, bands, b_flat, ks_max, H, W, C)
    return out_flat.reshape(N, H, W, C)


def mixconv_forward(x_nchw, params, io_dtype=None):
    """NCHW module contract; thin layout plumbing around the NHWC core."""
    x_nhwc = jnp.transpose(x_nchw, (0, 2, 3, 1))
    out_nhwc = mixconv_forward_nhwc(x_nhwc, params, io_dtype=io_dtype)
    return jnp.transpose(out_nhwc, (0, 3, 1, 2))


# ----------------------------------------------------------------------------
# Pure-JAX reference (correctness check only).
# ----------------------------------------------------------------------------
def mixconv_reference(x_nchw, params):
    outs = []
    start = 0
    for g in params:
        ic, ks = g["ic"], g["ks"]
        part = x_nchw[:, start:start + ic]
        start += ic
        p = ks // 2
        out = jax.lax.conv_general_dilated(
            part, g["w"], window_strides=(1, 1), padding=((p, p), (p, p)),
            dimension_numbers=("NCHW", "OIHW", "NCHW"),
            feature_group_count=ic)
        outs.append(out + g["b"][None, :, None, None])
    return jnp.concatenate(outs, axis=1)


if __name__ == "__main__":
    key = jax.random.PRNGKey(0)
    k_x, k_p = jax.random.split(key)

    # MixConv(in_channels=8, out_channels=8, kernel_size=[3, 5], depthwise=True)
    # -> two depthwise groups of 4 channels with kernel sizes 3 and 5.
    in_channels, out_channels = 8, 8
    kernel_sizes = [3, 5]
    N, H, W = 2, 16, 16

    x = _bf16_exact(jax.random.normal(k_x, (N, in_channels, H, W), jnp.float32))
    params = init_mixconv_params(k_p, in_channels, out_channels, kernel_sizes)

    ref = mixconv_reference(x, params)

    # f32 I/O path (default; v5e-friendly).
    out = jax.block_until_ready(mixconv_forward(x, params))
    assert out.shape == (N, out_channels, H, W)
    assert jnp.allclose(out, ref, rtol=1e-3, atol=1e-3), "f32 path mismatch"

    # bf16 I/O path (v6e/v7x: halves HBM traffic / VMEM; f32 accumulation).
    out_bf16 = jax.block_until_ready(
        mixconv_forward(x, params, io_dtype=jnp.bfloat16))
    assert jnp.allclose(out_bf16.astype(jnp.float32), ref,
                        rtol=2e-2, atol=2e-2), "bf16 path mismatch"

    print("KERNEL_OK")
</pallas_src>

<mosaic_0001>
module attributes {stable_mosaic.version = 11 : i64} {
  func.func @kernel(%arg0: i32, %arg1: memref<2x16x128xf32, #tpu.memory_space<vmem>>, %arg2: memref<5x128x128xf32, #tpu.memory_space<vmem>>, %arg3: memref<1x128xf32, #tpu.memory_space<vmem>>, %arg4: memref<2x16x128xf32, #tpu.memory_space<vmem>>, %arg5: memref<2x20x128xf32, #tpu.memory_space<vmem>>) attributes {dimension_semantics = [#tpu.dimension_semantics<arbitrary>], iteration_bounds = array<i64: 1>, scalar_prefetch = 0 : i64, scratch_operands = 1 : i64, tpu.core_type = #tpu.core_type<tc>, window_params = [{transform_indices = @transform_0, window_bounds = array<i64: 2, 16, 128>}, {pipeline_mode = #tpu.pipeline_mode<synchronous>, transform_indices = @transform_1, window_bounds = array<i64: 5, 128, 128>}, {pipeline_mode = #tpu.pipeline_mode<synchronous>, transform_indices = @transform_2, window_bounds = array<i64: 1, 128>}, {transform_indices = @transform_3, window_bounds = array<i64: 2, 16, 128>}]} {
    %cst = arith.constant 0.000000e+00 : f32
    %0 = vector.broadcast %cst : f32 to vector<2x2x128xf32>
    %c0 = arith.constant 0 : index
    %c0_0 = arith.constant 0 : index
    %c0_1 = arith.constant 0 : index
    %1 = vector.load %arg5[%c0, %c0_0, %c0_1] : memref<2x20x128xf32, #tpu.memory_space<vmem>>, vector<2x2x128xf32>
    tpu.vector_store %arg5[%c0, %c0_0, %c0_1], %0 {strides = array<i32>} : memref<2x20x128xf32, #tpu.memory_space<vmem>>, vector<2x2x128xf32>,
    %cst_2 = arith.constant 0.000000e+00 : f32
    %2 = vector.broadcast %cst_2 : f32 to vector<2x2x128xf32>
    %c0_3 = arith.constant 0 : index
    %c18 = arith.constant 18 : index
    %c0_4 = arith.constant 0 : index
    %3 = vector.load %arg5[%c0_3, %c18, %c0_4] : memref<2x20x128xf32, #tpu.memory_space<vmem>>, vector<2x2x128xf32>
    tpu.vector_store %arg5[%c0_3, %c18, %c0_4], %2 {strides = array<i32>} : memref<2x20x128xf32, #tpu.memory_space<vmem>>, vector<2x2x128xf32>,
    %c0_5 = arith.constant 0 : index
    %c0_6 = arith.constant 0 : index
    %c0_7 = arith.constant 0 : index
    %4 = vector.load %arg1[%c0_5, %c0_6, %c0_7] : memref<2x16x128xf32, #tpu.memory_space<vmem>>, vector<2x16x128xf32>
    %c0_8 = arith.constant 0 : index
    %c2 = arith.constant 2 : index
    %c0_9 = arith.constant 0 : index
    %5 = vector.load %arg5[%c0_8, %c2, %c0_9] : memref<2x20x128xf32, #tpu.memory_space<vmem>>, vector<2x16x128xf32>
    tpu.vector_store %arg5[%c0_8, %c2, %c0_9], %4 {strides = array<i32>} : memref<2x20x128xf32, #tpu.memory_space<vmem>>, vector<2x16x128xf32>,
    %c0_10 = arith.constant 0 : index
    %c0_11 = arith.constant 0 : index
    %6 = vector.load %arg3[%c0_10, %c0_11] : memref<1x128xf32, #tpu.memory_space<vmem>>, vector<1x128xf32>
    %7 = vector.shape_cast %6 : vector<1x128xf32> to vector<1x128xf32>
    %8 = vector.broadcast %7 : vector<1x128xf32> to vector<16x128xf32>
    %c0_12 = arith.constant 0 : index
    %c0_13 = arith.constant 0 : index
    %c0_14 = arith.constant 0 : index
    %9 = vector.load %arg5[%c0_12, %c0_13, %c0_14] : memref<2x20x128xf32, #tpu.memory_space<vmem>>, vector<1x16x128xf32>
    %10 = vector.shape_cast %9 : vector<1x16x128xf32> to vector<16x128xf32>
    %c0_15 = arith.constant 0 : index
    %c0_16 = arith.constant 0 : index
    %c0_17 = arith.constant 0 : index
    %11 = vector.load %arg2[%c0_15, %c0_16, %c0_17] : memref<5x128x128xf32, #tpu.memory_space<vmem>>, vector<1x128x128xf32>
    %12 = vector.shape_cast %11 : vector<1x128x128xf32> to vector<128x128xf32>
    %cst_18 = arith.constant dense<0.000000e+00> : vector<16x128xf32>
    %13 = tpu.matmul %10, %12, %cst_18 {dimension_numbers = #tpu.dot_dimension_numbers<[1], [0], [0], [1], [0, 0, 1, 1], [], []>} : vector<16x128xf32>, vector<128x128xf32>, vector<16x128xf32> -> vector<16x128xf32>
    %14 = arith.addf %8, %13 : vector<16x128xf32>
    %c0_19 = arith.constant 0 : index
    %c1 = arith.constant 1 : index
    %c0_20 = arith.constant 0 : index
    %15 = vector.load %arg5[%c0_19, %c1, %c0_20] : memref<2x20x128xf32, #tpu.memory_space<vmem>>, vector<1x16x128xf32>
    %16 = vector.shape_cast %15 : vector<1x16x128xf32> to vector<16x128xf32>
    %c1_21 = arith.constant 1 : index
    %c0_22 = arith.constant 0 : index
    %c0_23 = arith.constant 0 : index
    %17 = vector.load %arg2[%c1_21, %c0_22, %c0_23] : memref<5x128x128xf32, #tpu.memory_space<vmem>>, vector<1x128x128xf32>
    %18 = vector.shape_cast %17 : vector<1x128x128xf32> to vector<128x128xf32>
    %cst_24 = arith.constant dense<0.000000e+00> : vector<16x128xf32>
    %19 = tpu.matmul %16, %18, %cst_24 {dimension_numbers = #tpu.dot_dimension_numbers<[1], [0], [0], [1], [0, 0, 1, 1], [], []>} : vector<16x128xf32>, vector<128x128xf32>, vector<16x128xf32> -> vector<16x128xf32>
    %20 = arith.addf %14, %19 : vector<16x128xf32>
    %c0_25 = arith.constant 0 : index
    %c2_26 = arith.constant 2 : index
    %c0_27 = arith.constant 0 : index
    %21 = vector.load %arg5[%c0_25, %c2_26, %c0_27] : memref<2x20x128xf32, #tpu.memory_space<vmem>>, vector<1x16x128xf32>
    %22 = vector.shape_cast %21 : vector<1x16x128xf32> to vector<16x128xf32>
    %c2_28 = arith.constant 2 : index
    %c0_29 = arith.constant 0 : index
    %c0_30 = arith.constant 0 : index
    %23 = vector.load %arg2[%c2_28, %c0_29, %c0_30] : memref<5x128x128xf32, #tpu.memory_space<vmem>>, vector<1x128x128xf32>
    %24 = vector.shape_cast %23 : vector<1x128x128xf32> to vector<128x128xf32>
    %cst_31 = arith.constant dense<0.000000e+00> : vector<16x128xf32>
    %25 = tpu.matmul %22, %24, %cst_31 {dimension_numbers = #tpu.dot_dimension_numbers<[1], [0], [0], [1], [0, 0, 1, 1], [], []>} : vector<16x128xf32>, vector<128x128xf32>, vector<16x128xf32> -> vector<16x128xf32>
    %26 = arith.addf %20, %25 : vector<16x128xf32>
    %c0_32 = arith.constant 0 : index
    %c3 = arith.constant 3 : index
    %c0_33 = arith.constant 0 : index
    %27 = vector.load %arg5[%c0_32, %c3, %c0_33] : memref<2x20x128xf32, #tpu.memory_space<vmem>>, vector<1x16x128xf32>
    %28 = vector.shape_cast %27 : vector<1x16x128xf32> to vector<16x128xf32>
    %c3_34 = arith.constant 3 : index
    %c0_35 = arith.constant 0 : index
    %c0_36 = arith.constant 0 : index
    %29 = vector.load %arg2[%c3_34, %c0_35, %c0_36] : memref<5x128x128xf32, #tpu.memory_space<vmem>>, vector<1x128x128xf32>
    %30 = vector.shape_cast %29 : vector<1x128x128xf32> to vector<128x128xf32>
    %cst_37 = arith.constant dense<0.000000e+00> : vector<16x128xf32>
    %31 = tpu.matmul %28, %30, %cst_37 {dimension_numbers = #tpu.dot_dimension_numbers<[1], [0], [0], [1], [0, 0, 1, 1], [], []>} : vector<16x128xf32>, vector<128x128xf32>, vector<16x128xf32> -> vector<16x128xf32>
    %32 = arith.addf %26, %31 : vector<16x128xf32>
    %c0_38 = arith.constant 0 : index
    %c4 = arith.constant 4 : index
    %c0_39 = arith.constant 0 : index
    %33 = vector.load %arg5[%c0_38, %c4, %c0_39] : memref<2x20x128xf32, #tpu.memory_space<vmem>>, vector<1x16x128xf32>
    %34 = vector.shape_cast %33 : vector<1x16x128xf32> to vector<16x128xf32>
    %c4_40 = arith.constant 4 : index
    %c0_41 = arith.constant 0 : index
    %c0_42 = arith.constant 0 : index
    %35 = vector.load %arg2[%c4_40, %c0_41, %c0_42] : memref<5x128x128xf32, #tpu.memory_space<vmem>>, vector<1x128x128xf32>
    %36 = vector.shape_cast %35 : vector<1x128x128xf32> to vector<128x128xf32>
    %cst_43 = arith.constant dense<0.000000e+00> : vector<16x128xf32>
    %37 = tpu.matmul %34, %36, %cst_43 {dimension_numbers = #tpu.dot_dimension_numbers<[1], [0], [0], [1], [0, 0, 1, 1], [], []>} : vector<16x128xf32>, vector<128x128xf32>, vector<16x128xf32> -> vector<16x128xf32>
    %38 = arith.addf %32, %37 : vector<16x128xf32>
    %c0_44 = arith.constant 0 : index
    %c0_45 = arith.constant 0 : index
    %c0_46 = arith.constant 0 : index
    %39 = vector.load %arg4[%c0_44, %c0_45, %c0_46] : memref<2x16x128xf32, #tpu.memory_space<vmem>>, vector<1x16x128xf32>
    %40 = vector.shape_cast %39 : vector<1x16x128xf32> to vector<16x128xf32>
    %41 = vector.shape_cast %38 : vector<16x128xf32> to vector<1x16x128xf32>
    tpu.vector_store %arg4[%c0_44, %c0_45, %c0_46], %41 {strides = array<i32>} : memref<2x16x128xf32, #tpu.memory_space<vmem>>, vector<1x16x128xf32>,
    %c1_47 = arith.constant 1 : index
    %c0_48 = arith.constant 0 : index
    %c0_49 = arith.constant 0 : index
    %42 = vector.load %arg5[%c1_47, %c0_48, %c0_49] : memref<2x20x128xf32, #tpu.memory_space<vmem>>, vector<1x16x128xf32>
    %43 = vector.shape_cast %42 : vector<1x16x128xf32> to vector<16x128xf32>
    %c0_50 = arith.constant 0 : index
    %c0_51 = arith.constant 0 : index
    %c0_52 = arith.constant 0 : index
    %44 = vector.load %arg2[%c0_50, %c0_51, %c0_52] : memref<5x128x128xf32, #tpu.memory_space<vmem>>, vector<1x128x128xf32>
    %45 = vector.shape_cast %44 : vector<1x128x128xf32> to vector<128x128xf32>
    %cst_53 = arith.constant dense<0.000000e+00> : vector<16x128xf32>
    %46 = tpu.matmul %43, %45, %cst_53 {dimension_numbers = #tpu.dot_dimension_numbers<[1], [0], [0], [1], [0, 0, 1, 1], [], []>} : vector<16x128xf32>, vector<128x128xf32>, vector<16x128xf32> -> vector<16x128xf32>
    %47 = arith.addf %8, %46 : vector<16x128xf32>
    %c1_54 = arith.constant 1 : index
    %c1_55 = arith.constant 1 : index
    %c0_56 = arith.constant 0 : index
    %48 = vector.load %arg5[%c1_54, %c1_55, %c0_56] : memref<2x20x128xf32, #tpu.memory_space<vmem>>, vector<1x16x128xf32>
    %49 = vector.shape_cast %48 : vector<1x16x128xf32> to vector<16x128xf32>
    %c1_57 = arith.constant 1 : index
    %c0_58 = arith.constant 0 : index
    %c0_59 = arith.constant 0 : index
    %50 = vector.load %arg2[%c1_57, %c0_58, %c0_59] : memref<5x128x128xf32, #tpu.memory_space<vmem>>, vector<1x128x128xf32>
    %51 = vector.shape_cast %50 : vector<1x128x128xf32> to vector<128x128xf32>
    %cst_60 = arith.constant dense<0.000000e+00> : vector<16x128xf32>
    %52 = tpu.matmul %49, %51, %cst_60 {dimension_numbers = #tpu.dot_dimension_numbers<[1], [0], [0], [1], [0, 0, 1, 1], [], []>} : vector<16x128xf32>, vector<128x128xf32>, vector<16x128xf32> -> vector<16x128xf32>
    %53 = arith.addf %47, %52 : vector<16x128xf32>
    %c1_61 = arith.constant 1 : index
    %c2_62 = arith.constant 2 : index
    %c0_63 = arith.constant 0 : index
    %54 = vector.load %arg5[%c1_61, %c2_62, %c0_63] : memref<2x20x128xf32, #tpu.memory_space<vmem>>, vector<1x16x128xf32>
    %55 = vector.shape_cast %54 : vector<1x16x128xf32> to vector<16x128xf32>
    %c2_64 = arith.constant 2 : index
    %c0_65 = arith.constant 0 : index
    %c0_66 = arith.constant 0 : index
    %56 = vector.load %arg2[%c2_64, %c0_65, %c0_66] : memref<5x128x128xf32, #tpu.memory_space<vmem>>, vector<1x128x128xf32>
    %57 = vector.shape_cast %56 : vector<1x128x128xf32> to vector<128x128xf32>
    %cst_67 = arith.constant dense<0.000000e+00> : vector<16x128xf32>
    %58 = tpu.matmul %55, %57, %cst_67 {dimension_numbers = #tpu.dot_dimension_numbers<[1], [0], [0], [1], [0, 0, 1, 1], [], []>} : vector<16x128xf32>, vector<128x128xf32>, vector<16x128xf32> -> vector<16x128xf32>
    %59 = arith.addf %53, %58 : vector<16x128xf32>
    %c1_68 = arith.constant 1 : index
    %c3_69 = arith.constant 3 : index
    %c0_70 = arith.constant 0 : index
    %60 = vector.load %arg5[%c1_68, %c3_69, %c0_70] : memref<2x20x128xf32, #tpu.memory_space<vmem>>, vector<1x16x128xf32>
    %61 = vector.shape_cast %60 : vector<1x16x128xf32> to vector<16x128xf32>
    %c3_71 = arith.constant 3 : index
    %c0_72 = arith.constant 0 : index
    %c0_73 = arith.constant 0 : index
    %62 = vector.load %arg2[%c3_71, %c0_72, %c0_73] : memref<5x128x128xf32, #tpu.memory_space<vmem>>, vector<1x128x128xf32>
    %63 = vector.shape_cast %62 : vector<1x128x128xf32> to vector<128x128xf32>
    %cst_74 = arith.constant dense<0.000000e+00> : vector<16x128xf32>
    %64 = tpu.matmul %61, %63, %cst_74 {dimension_numbers = #tpu.dot_dimension_numbers<[1], [0], [0], [1], [0, 0, 1, 1], [], []>} : vector<16x128xf32>, vector<128x128xf32>, vector<16x128xf32> -> vector<16x128xf32>
    %65 = arith.addf %59, %64 : vector<16x128xf32>
    %c1_75 = arith.constant 1 : index
    %c4_76 = arith.constant 4 : index
    %c0_77 = arith.constant 0 : index
    %66 = vector.load %arg5[%c1_75, %c4_76, %c0_77] : memref<2x20x128xf32, #tpu.memory_space<vmem>>, vector<1x16x128xf32>
    %67 = vector.shape_cast %66 : vector<1x16x128xf32> to vector<16x128xf32>
    %c4_78 = arith.constant 4 : index
    %c0_79 = arith.constant 0 : index
    %c0_80 = arith.constant 0 : index
    %68 = vector.load %arg2[%c4_78, %c0_79, %c0_80] : memref<5x128x128xf32, #tpu.memory_space<vmem>>, vector<1x128x128xf32>
    %69 = vector.shape_cast %68 : vector<1x128x128xf32> to vector<128x128xf32>
    %cst_81 = arith.constant dense<0.000000e+00> : vector<16x128xf32>
    %70 = tpu.matmul %67, %69, %cst_81 {dimension_numbers = #tpu.dot_dimension_numbers<[1], [0], [0], [1], [0, 0, 1, 1], [], []>} : vector<16x128xf32>, vector<128x128xf32>, vector<16x128xf32> -> vector<16x128xf32>
    %71 = arith.addf %65, %70 : vector<16x128xf32>
    %c1_82 = arith.constant 1 : index
    %c0_83 = arith.constant 0 : index
    %c0_84 = arith.constant 0 : index
    %72 = vector.load %arg4[%c1_82, %c0_83, %c0_84] : memref<2x16x128xf32, #tpu.memory_space<vmem>>, vector<1x16x128xf32>
    %73 = vector.shape_cast %72 : vector<1x16x128xf32> to vector<16x128xf32>
    %74 = vector.shape_cast %71 : vector<16x128xf32> to vector<1x16x128xf32>
    tpu.vector_store %arg4[%c1_82, %c0_83, %c0_84], %74 {strides = array<i32>} : memref<2x16x128xf32, #tpu.memory_space<vmem>>, vector<1x16x128xf32>,
    return
  }
  func.func @transform_0(%arg0: i32) -> (i32, i32, i32) {
    %c0_i32 = arith.constant 0 : i32
    %c0_i32_0 = arith.constant 0 : i32
    %c0_i32_1 = arith.constant 0 : i32
    return %arg0, %c0_i32, %c0_i32_0 : i32, i32, i32
  }
  func.func @transform_1(%arg0: i32) -> (i32, i32, i32) {
    %c0_i32 = arith.constant 0 : i32
    %c0_i32_0 = arith.constant 0 : i32
    %c0_i32_1 = arith.constant 0 : i32
    %c0_i32_2 = arith.constant 0 : i32
    return %c0_i32, %c0_i32_0, %c0_i32_1 : i32, i32, i32
  }
  func.func @transform_2(%arg0: i32) -> (i32, i32) {
    %c0_i32 = arith.constant 0 : i32
    %c0_i32_0 = arith.constant 0 : i32
    %c0_i32_1 = arith.constant 0 : i32
    return %c0_i32, %c0_i32_0 : i32, i32
  }
  func.func @transform_3(%arg0: i32) -> (i32, i32, i32) {
    %c0_i32 = arith.constant 0 : i32
    %c0_i32_0 = arith.constant 0 : i32
    %c0_i32_1 = arith.constant 0 : i32
    return %arg0, %c0_i32, %c0_i32_0 : i32, i32, i32
  }
}

</mosaic_0001>

<bundles_post_ra>
// kernel: tpu_custom_call.1
= control target key start
LH: loop header
LB: loop body
LE: loop exit
PB: predicated region body
PF: predicated region fallthrough
CT: control target
= control target key end

     0   :  { %8 = vsyncpa [#allocation4], 0  ;;  %s2079_s0 = inlined_call_operand.hbm [shape: f32[2,16,128], index: 0, kind: input, shape index: {}]   ;;  %s2080_s1 = inlined_call_operand.hbm [shape: f32[5,128,128], index: 1, kind: input, shape index: {}]   ;;  %s2081_s2 = inlined_call_operand.vmem [shape: f32[1,128], index: 2, kind: input, shape index: {}]   ;;  %s2082_s3 = inlined_call_operand.hbm [shape: f32[2,16,128], index: 3, kind: output, shape index: {}]  }
   0x1   :  { %9 = vsyncpa [#allocation7], 0 }
   0x2   :  { %10 = vsyncpa [#allocation5], 0  ;;  %s1989_s12 = smov [#allocation3]   ;;  %s1917_s16 = scalar_lea.hbm %s2079_s0, 512 }
   0x3   :  { %s16_s13 = sshll.u32 %s1989_s12, 4  ;;  %p1918_p0 = scmp.ne.s32.totalorder %s2079_s0, %s1917_s16  ;;  %s17_s13 = int_to_ptr.vmem [resolvable:$true] %s16_s13 }
   0x4   :  { %p1921_p1 = scmp.lt.u32.totalorder %s1917_s16, %s2079_s0 }
   0x6   :  { %p1923_p2 = pnand %p1921_p1, %p1918_p0 }
   0x8   :  { %1926 = shalt.err (!%p1923_p2)
}
   0x9   :  { %s1927_s21 = scalar_lea.vmem %s17_s13, 512  ;;  %p1932_p4 = scmp.lt.s32.totalorder %s17_s13, %s17_s13 }
   0xa   :  { %p1928_p3 = scmp.ne.s32.totalorder %s17_s13, %s1927_s21  ;;  %p1933_p5 = scmp.lt.s32.totalorder %s1927_s21, %s1927_s21 }
   0xc   :  { %p1934_p6 = por %p1933_p5, %p1932_p4 }
   0xe   :  { %p1935_p7 = pnand %p1934_p6, %p1928_p3 }
  0x10   :  { %1938 = shalt.err (!%p1935_p7)
}
  0x11   :  { %s1990_s22 = smov 128   ;;  %s1991_s23 = smov 8  }
  0x12   :  { %22 = dma.hbm_to_vmem [thread:$0]  %s2079_s0, 512, %s17_s13, [#allocation4], %s1990_s22, %s1990_s22, %s1991_s23  }
  0x13   :  { %s1992_s26 = smov [#allocation6]   ;;  %s1939_s30 = scalar_lea.hbm %s2080_s1, 10240 }
  0x14   :  { %s28_s27 = sshll.u32 %s1992_s26, 4  ;;  %p1940_p8 = scmp.ne.s32.totalorder %s2080_s1, %s1939_s30  ;;  %s29_s27 = int_to_ptr.vmem [resolvable:$true] %s28_s27 }
  0x15   :  { %p1943_p9 = scmp.lt.u32.totalorder %s1939_s30, %s2080_s1 }
  0x17   :  { %p1945_p10 = pnand %p1943_p9, %p1940_p8 }
  0x19   :  { %1948 = shalt.err (!%p1945_p10)
}
  0x1a   :  { %s1949_s8 = scalar_lea.vmem %s29_s27, 10240  ;;  %p1954_p12 = scmp.lt.s32.totalorder %s29_s27, %s29_s27 }
  0x1b   :  { %p1950_p11 = scmp.ne.s32.totalorder %s29_s27, %s1949_s8  ;;  %p1955_p13 = scmp.lt.s32.totalorder %s1949_s8, %s1949_s8 }
  0x1d   :  { %p1956_p0 = por %p1955_p13, %p1954_p12 }
  0x1f   :  { %p1957_p1 = pnand %p1956_p0, %p1950_p11 }
  0x21   :  { %1960 = shalt.err (!%p1957_p1)
}
  0x22   :  { %34 = dma.hbm_to_vmem [thread:$0]  %s2080_s1, 10240, %s29_s27, [#allocation7], %s1990_s22, %s1990_s22, %s1991_s23  }
  0x23   :  { %1983 = dma.done.wait [#allocation4], 512  }
  0x24   :  { %1984 = vsyncadd [#allocation4], 4294966784 }
  0x25   :  { %1985 = dma.done.wait [#allocation7], 10240  }
  0x26   :  { %1986 = vsyncadd [#allocation7], 4294957056  ;;  %v1993_v0 = vmov 0.0   ;;  %v64_v1 = vld [vmem:[#allocation6] sm:$0xff]  ;;  %v65_v2 = vld [vmem:[#allocation6 + $0x8] sm:$0xff]  ;;  %s1994_s11 = smov [#allocation8]  }
  0x27   :  { %43 = vst [vmem:[#allocation2] sm:$0x3] %v1993_v0  ;;  %44 = vst [vmem:[#allocation2 + $0x18] sm:$0x3] %v1993_v0  ;;  %v66_v3 = vld [vmem:[#allocation6 + $0x10] sm:$0xff]  ;;  %v1571_v4 = vpack.c.bf16 %v65_v2, %v64_v1  ;;  %v67_v5 = vld [vmem:[#allocation6 + $0x18] sm:$0xff] }
  0x28   :  { %45 = vst [vmem:[#allocation2 + $0x12] sm:$0x3] %v1993_v0  ;;  %46 = vst [vmem:[#allocation2 + $0x2a] sm:$0x3] %v1993_v0  ;;  %v1575_v6 = vpack.c.bf16 %v67_v5, %v66_v3  ;;  %v68_v7 = vld [vmem:[#allocation6 + $0x20] sm:$0xff]  ;;  %v69_v8 = vld [vmem:[#allocation6 + $0x28] sm:$0xff] }
  0x29   :  { %1572 = vmatprep.subr.bf16.mxu0 %v1571_v4  ;;  %1732 = vmatprep.subr.bf16.mxu1 %v1571_v4  ;;  %v1579_v9 = vpack.c.bf16 %v69_v8, %v68_v7  ;;  %v70_v10 = vld [vmem:[#allocation6 + $0x30] sm:$0xff]  ;;  %v2045_v11 = vld [vmem:[#allocation3] sm:$0xff]  ;;  %v71_v12 = vld [vmem:[#allocation6 + $0x38] sm:$0xff]  ;;  %s1027_s12 = sshll.u32 %s1994_s11, 4  ;;  %s1028_s12 = int_to_ptr.vmem [resolvable:$true] %s1027_s12 }
  0x2a   :  { %1574 = vmatpush3.bf16.msra.mxu0 %v1571_v4  ;;  %1734 = vmatpush3.bf16.msra.mxu1 %v1571_v4  ;;  %51 = vst [vmem:[#allocation2 + $0x2] sm:$0xff] %v2045_v11  ;;  %v2048_v13 = vld [vmem:[#allocation3 + $0x10] sm:$0xff]  ;;  %v2050_v14 = vld [vmem:[#allocation3 + $0x8] sm:$0xff]  ;;  %v2054_v15 = vld [vmem:[#allocation3 + $0x18] sm:$0xff]  ;;  %v1583_v16 = vpack.c.bf16 %v71_v12, %v70_v10  ;;  %s1961_s13 = scalar_lea.vmem %s1028_s12, 512  ;;  %p1966_p3 = scmp.lt.s32.totalorder %s1028_s12, %s1028_s12 }
  0x2b   :  { %1576 = vmatprep.subr.bf16.mxu0 %v1575_v6  ;;  %1736 = vmatprep.subr.bf16.mxu1 %v1575_v6  ;;  %53 = vst [vmem:[#allocation2 + $0x1a] sm:$0xff] %v2048_v13  ;;  %52 = vst [vmem:[#allocation2 + $0xa] sm:$0xff] %v2050_v14  ;;  %v72_v17 = vld [vmem:[#allocation6 + $0x40] sm:$0xff]  ;;  %v73_v18 = vld [vmem:[#allocation6 + $0x48] sm:$0xff]  ;;  %p1962_p2 = scmp.ne.s32.totalorder %s1028_s12, %s1961_s13  ;;  %p1967_p4 = scmp.lt.s32.totalorder %s1961_s13, %s1961_s13 }
  0x2c   :  { %54 = vst [vmem:[#allocation2 + $0x22] sm:$0xff] %v2054_v15  ;;  %v1587_v19 = vpack.c.bf16 %v73_v18, %v72_v17  ;;  %v74_v21 = vld [vmem:[#allocation6 + $0x50] sm:$0xff]  ;;  %v75_v22 = vld [vmem:[#allocation6 + $0x58] sm:$0xff]  ;;  %v76_v25 = vld [vmem:[#allocation6 + $0x60] sm:$0xff] }
  0x2d   :  { %v1591_v24 = vpack.c.bf16 %v75_v22, %v74_v21  ;;  %v77_v26 = vld [vmem:[#allocation6 + $0x68] sm:$0xff]  ;;  %v78_v28 = vld [vmem:[#allocation6 + $0x70] sm:$0xff]  ;;  %v79_v29 = vld [vmem:[#allocation6 + $0x78] sm:$0xff]  ;;  %p1968_p5 = por %p1967_p4, %p1966_p3 }
  0x2e   :  { %1578 = vmatpush3.bf16.msra.mxu0 %v1575_v6  ;;  %1738 = vmatpush3.bf16.msra.mxu1 %v1575_v6  ;;  %v1595_v27 = vpack.c.bf16 %v77_v26, %v76_v25  ;;  %v1599_v30 = vpack.c.bf16 %v79_v29, %v78_v28  ;;  %v160_v31 = vld [vmem:[#allocation6 + $0x80] sm:$0xff]  ;;  %v161_v32 = vld [vmem:[#allocation6 + $0x88] sm:$0xff]  ;;  %v162_v34 = vld [vmem:[#allocation6 + $0x90] sm:$0xff] }
  0x2f   :  { %1580 = vmatprep.subr.bf16.mxu0 %v1579_v9  ;;  %1740 = vmatprep.subr.bf16.mxu1 %v1579_v9  ;;  %v1603_v33 = vpack.c.bf16 %v161_v32, %v160_v31  ;;  %v163_v35 = vld [vmem:[#allocation6 + $0x98] sm:$0xff]  ;;  %v164_v39 = vld [vmem:[#allocation6 + $0xa0] sm:$0xff]  ;;  %v165_v40 = vld [vmem:[#allocation6 + $0xa8] sm:$0xff]  ;;  %p1969_p6 = pnand %p1968_p5, %p1962_p2 }
  0x30   :  { %v1607_v38 = vpack.c.bf16 %v163_v35, %v162_v34  ;;  %v1611_v43 = vpack.c.bf16 %v165_v40, %v164_v39  ;;  %v166_v44 = vld [vmem:[#allocation6 + $0xb0] sm:$0xff]  ;;  %v167_v45 = vld [vmem:[#allocation6 + $0xb8] sm:$0xff]  ;;  %v168_v47 = vld [vmem:[#allocation6 + $0xc0] sm:$0xff] }
  0x31   :  { %v62_v20 = vld [vmem:[#allocation2] sm:$0xff]  ;;  %v1615_v46 = vpack.c.bf16 %v167_v45, %v166_v44  ;;  %v169_v48 = vld [vmem:[#allocation6 + $0xc8] sm:$0xff]  ;;  %v171_v51 = vld [vmem:[#allocation6 + $0xd8] sm:$0xff] }
  0x32   :  { %1582 = vmatpush3.bf16.msra.mxu0 %v1579_v9  ;;  %1742 = vmatpush3.bf16.msra.mxu1 %v1579_v9  ;;  %v544_v23 = vld [vmem:[#allocation2 + $0x18] sm:$0xff]  ;;  %v63_v36 = vld [vmem:[#allocation2 + $0x8] sm:$0xff]  ;;  %v1619_v49 = vpack.c.bf16 %v169_v48, %v168_v47  ;;  %v170_v50 = vld [vmem:[#allocation6 + $0xd0] sm:$0xff] }
  0x33   :  { %1584 = vmatprep.subr.bf16.mxu0 %v1583_v16  ;;  %1744 = vmatprep.subr.bf16.mxu1 %v1583_v16  ;;  %v545_v37 = vld [vmem:[#allocation2 + $0x20] sm:$0xff]  ;;  %v1623_v52 = vpack.c.bf16 %v171_v51, %v170_v50  ;;  %v172_v53 = vld [vmem:[#allocation6 + $0xe0] sm:$0xff]  ;;  %v173_v54 = vld [vmem:[#allocation6 + $0xe8] sm:$0xff] }
  0x34   :  { %1253 = vmatprep.mubr.f32.mxu0 %v62_v20  ;;  %1428 = vmatprep.mubr.f32.mxu1 %v544_v23  ;;  %v157_v41 = vld [vmem:[#allocation2 + $0x1] sm:$0xff]  ;;  %v639_v42 = vld [vmem:[#allocation2 + $0x19] sm:$0xff]  ;;  %v1627_v55 = vpack.c.bf16 %v173_v54, %v172_v53  ;;  %v256_v59 = vld [vmem:[#allocation6 + $0x100] sm:$0xff] }
  0x35   :  { %v174_v56 = vld [vmem:[#allocation6 + $0xf0] sm:$0xff]  ;;  %v175_v57 = vld [vmem:[#allocation6 + $0xf8] sm:$0xff]  ;;  %v257_v60 = vld [vmem:[#allocation6 + $0x108] sm:$0xff] }
  0x36   :  { %1586 = vmatpush3.bf16.msra.mxu0 %v1583_v16  ;;  %1746 = vmatpush3.bf16.msra.mxu1 %v1583_v16  ;;  %v1631_v58 = vpack.c.bf16 %v175_v57, %v174_v56  ;;  %v1635_v61 = vpack.c.bf16 %v257_v60, %v256_v59  ;;  %v258_v62 = vld [vmem:[#allocation6 + $0x110] sm:$0xff]  ;;  %v259_v63 = vld [vmem:[#allocation6 + $0x118] sm:$0xff]  ;;  %v260_v3 = vld [vmem:[#allocation6 + $0x120] sm:$0xff] }
  0x37   :  { %1588 = vmatprep.subr.bf16.mxu0 %v1587_v19  ;;  %1748 = vmatprep.subr.bf16.mxu1 %v1587_v19  ;;  %v158_v0 = vld [vmem:[#allocation2 + $0x9] sm:$0xff]  ;;  %v640_v1 = vld [vmem:[#allocation2 + $0x21] sm:$0xff]  ;;  %v1639_v2 = vpack.c.bf16 %v259_v63, %v258_v62  ;;  %v261_v4 = vld [vmem:[#allocation6 + $0x128] sm:$0xff] }
  0x38   :  { %v1643_v5 = vpack.c.bf16 %v261_v4, %v260_v3  ;;  %v262_v6 = vld [vmem:[#allocation6 + $0x130] sm:$0xff]  ;;  %v263_v7 = vld [vmem:[#allocation6 + $0x138] sm:$0xff]  ;;  %v264_v9 = vld [vmem:[#allocation6 + $0x140] sm:$0xff] }
  0x39   :  { %v1647_v8 = vpack.c.bf16 %v263_v7, %v262_v6  ;;  %v265_v10 = vld [vmem:[#allocation6 + $0x148] sm:$0xff]  ;;  %v266_v16 = vld [vmem:[#allocation6 + $0x150] sm:$0xff]  ;;  %v267_v17 = vld [vmem:[#allocation6 + $0x158] sm:$0xff] }
  0x3a   :  { %1590 = vmatpush3.bf16.msra.mxu0 %v1587_v19  ;;  %1750 = vmatpush3.bf16.msra.mxu1 %v1587_v19  ;;  %v1651_v12 = vpack.c.bf16 %v265_v10, %v264_v9  ;;  %v269_v18 = vld [vmem:[#allocation6 + $0x168] sm:$0xff]  ;;  %v270_v20 = vld [vmem:[#allocation6 + $0x170] sm:$0xff]  ;;  %v271_v21 = vld [vmem:[#allocation6 + $0x178] sm:$0xff] }
  0x3b   :  { %1592 = vmatprep.subr.bf16.mxu0 %v1591_v24  ;;  %1752 = vmatprep.subr.bf16.mxu1 %v1591_v24  ;;  %v1663_v22 = vpack.c.bf16 %v271_v21, %v270_v20  ;;  %v352_v23 = vld [vmem:[#allocation6 + $0x180] sm:$0xff]  ;;  %v354_v26 = vld [vmem:[#allocation6 + $0x190] sm:$0xff]  ;;  %v359_v35 = vld [vmem:[#allocation6 + $0x1b8] sm:$0xff] }
  0x3c   :  { %v356_v29 = vld [vmem:[#allocation6 + $0x1a0] sm:$0xff]  ;;  %v349_v31 = vld [vmem:[#allocation2 + $0x3] sm:$0xff]  ;;  %v829_v32 = vld [vmem:[#allocation2 + $0x1b] sm:$0xff] }
  0x3d   :  { %v358_v34 = vld [vmem:[#allocation6 + $0x1b0] sm:$0xff]  ;;  %v363_v39 = vld [vmem:[#allocation6 + $0x1d8] sm:$0xff]  ;;  %v448_v47 = vld [vmem:[#allocation6 + $0x200] sm:$0xff] }
  0x3e   :  { %1594 = vmatpush3.bf16.msra.mxu0 %v1591_v24  ;;  %1754 = vmatpush3.bf16.msra.mxu1 %v1591_v24  ;;  %v353_v24 = vld [vmem:[#allocation6 + $0x188] sm:$0xff]  ;;  %v366_v44 = vld [vmem:[#allocation6 + $0x1f0] sm:$0xff]  ;;  %v367_v45 = vld [vmem:[#allocation6 + $0x1f8] sm:$0xff] }
  0x3f   :  { %1596 = vmatprep.subr.bf16.mxu0 %v1595_v27  ;;  %1756 = vmatprep.subr.bf16.mxu1 %v1595_v27  ;;  %v1667_v25 = vpack.c.bf16 %v353_v24, %v352_v23  ;;  %v449_v48 = vld [vmem:[#allocation6 + $0x208] sm:$0xff]  ;;  %v450_v50 = vld [vmem:[#allocation6 + $0x210] sm:$0xff]  ;;  %v451_v51 = vld [vmem:[#allocation6 + $0x218] sm:$0xff] }
  0x40   :  { %v830_v53 = vld [vmem:[#allocation2 + $0x23] sm:$0xff]  ;;  %v1703_v54 = vpack.c.bf16 %v451_v51, %v450_v50  ;;  %v453_v56 = vld [vmem:[#allocation6 + $0x228] sm:$0xff]  ;;  %v456_v63 = vld [vmem:[#allocation6 + $0x240] sm:$0xff] }
  0x41   :  { %v445_v57 = vld [vmem:[#allocation2 + $0x4] sm:$0xff]  ;;  %v461_v6 = vld [vmem:[#allocation6 + $0x268] sm:$0xff] }
  0x42   :  { %1598 = vmatpush3.bf16.msra.mxu0 %v1595_v27  ;;  %1758 = vmatpush3.bf16.msra.mxu1 %v1595_v27  ;;  %v355_v27 = vld [vmem:[#allocation6 + $0x198] sm:$0xff]  ;;  %v454_v60 = vld [vmem:[#allocation6 + $0x230] sm:$0xff] }
  0x43   :  { %1600 = vmatprep.subr.bf16.mxu0 %v1599_v30  ;;  %1760 = vmatprep.subr.bf16.mxu1 %v1599_v30  ;;  %v1671_v28 = vpack.c.bf16 %v355_v27, %v354_v26  ;;  %v459_v3 = vld [vmem:[#allocation6 + $0x258] sm:$0xff] }
  0x44   :  { %v463_v9 = vld [vmem:[#allocation6 + $0x278] sm:$0xff] }
  0x46   :  { %1602 = vmatpush3.bf16.msra.mxu0 %v1599_v30  ;;  %1762 = vmatpush3.bf16.msra.mxu1 %v1599_v30  ;;  %v357_v30 = vld [vmem:[#allocation6 + $0x1a8] sm:$0xff] }
  0x47   :  { %1604 = vmatprep.subr.bf16.mxu0 %v1603_v33  ;;  %1764 = vmatprep.subr.bf16.mxu1 %v1603_v33 }
  0x49   :  { %1254 = vmatmul.mubr.f32.vlgmr.msra.gmra.mrb[0].mxu0 %v63_v36  ;;  %1429 = vmatmul.mubr.f32.vlgmr.msra.gmra.mrb[0].mxu1 %v545_v37  ;;  %v1679_v36 = vpack.c.bf16 %v359_v35, %v358_v34  ;;  %v360_v37 = vld [vmem:[#allocation6 + $0x1c0] sm:$0xff] }
  0x4a   :  { %1606 = vmatpush3.bf16.msra.mxu0 %v1603_v33  ;;  %1766 = vmatpush3.bf16.msra.mxu1 %v1603_v33  ;;  %v1675_v33 = vpack.c.bf16 %v357_v30, %v356_v29 }
  0x4b   :  { %1608 = vmatprep.subr.bf16.mxu0 %v1607_v38  ;;  %1768 = vmatprep.subr.bf16.mxu1 %v1607_v38 }
  0x4c   :  { %1288 = vmatprep.mubr.f32.mxu0 %v157_v41  ;;  %1463 = vmatprep.mubr.f32.mxu1 %v639_v42  ;;  %v364_v41 = vld [vmem:[#allocation6 + $0x1e0] sm:$0xff]  ;;  %v365_v42 = vld [vmem:[#allocation6 + $0x1e8] sm:$0xff] }
  0x4e   :  { %1610 = vmatpush3.bf16.msra.mxu0 %v1607_v38  ;;  %1770 = vmatpush3.bf16.msra.mxu1 %v1607_v38  ;;  %v362_v38 = vld [vmem:[#allocation6 + $0x1d0] sm:$0xff] }
  0x4f   :  { %1612 = vmatprep.subr.bf16.mxu0 %v1611_v43  ;;  %1772 = vmatprep.subr.bf16.mxu1 %v1611_v43  ;;  %v1687_v40 = vpack.c.bf16 %v363_v39, %v362_v38 }
  0x52   :  { %1614 = vmatpush3.bf16.msra.mxu0 %v1611_v43  ;;  %1774 = vmatpush3.bf16.msra.mxu1 %v1611_v43  ;;  %v1691_v43 = vpack.c.bf16 %v365_v42, %v364_v41 }
  0x53   :  { %1616 = vmatprep.subr.bf16.mxu0 %v1615_v46  ;;  %1776 = vmatprep.subr.bf16.mxu1 %v1615_v46 }
  0x56   :  { %1618 = vmatpush3.bf16.msra.mxu0 %v1615_v46  ;;  %1778 = vmatpush3.bf16.msra.mxu1 %v1615_v46  ;;  %v1695_v46 = vpack.c.bf16 %v367_v45, %v366_v44 }
  0x57   :  { %1620 = vmatprep.subr.bf16.mxu0 %v1619_v49  ;;  %1780 = vmatprep.subr.bf16.mxu1 %v1619_v49 }
  0x5a   :  { %1622 = vmatpush3.bf16.msra.mxu0 %v1619_v49  ;;  %1782 = vmatpush3.bf16.msra.mxu1 %v1619_v49  ;;  %v1699_v49 = vpack.c.bf16 %v449_v48, %v448_v47 }
  0x5b   :  { %1624 = vmatprep.subr.bf16.mxu0 %v1623_v52  ;;  %1784 = vmatprep.subr.bf16.mxu1 %v1623_v52 }
  0x5e   :  { %1626 = vmatpush3.bf16.msra.mxu0 %v1623_v52  ;;  %1786 = vmatpush3.bf16.msra.mxu1 %v1623_v52  ;;  %v350_v52 = vld [vmem:[#allocation2 + $0xb] sm:$0xff] }
  0x5f   :  { %1628 = vmatprep.subr.bf16.mxu0 %v1627_v55  ;;  %1788 = vmatprep.subr.bf16.mxu1 %v1627_v55 }
  0x62   :  { %1630 = vmatpush3.bf16.msra.mxu0 %v1627_v55  ;;  %1790 = vmatpush3.bf16.msra.mxu1 %v1627_v55  ;;  %v452_v55 = vld [vmem:[#allocation6 + $0x220] sm:$0xff] }
  0x63   :  { %1632 = vmatprep.subr.bf16.mxu0 %v1631_v58  ;;  %1792 = vmatprep.subr.bf16.mxu1 %v1631_v58  ;;  %v1707_v59 = vpack.c.bf16 %v453_v56, %v452_v55 }
  0x66   :  { %1634 = vmatpush3.bf16.msra.mxu0 %v1631_v58  ;;  %1794 = vmatpush3.bf16.msra.mxu1 %v1631_v58  ;;  %v924_v58 = vld [vmem:[#allocation2 + $0x1c] sm:$0xff] }
  0x67   :  { %1636 = vmatprep.subr.bf16.mxu0 %v1635_v61  ;;  %1796 = vmatprep.subr.bf16.mxu1 %v1635_v61 }
  0x69   :  { %1289 = vmatmul.mubr.f32.vlgmr.msra.gmra.mrb[0].mxu0 %v158_v0  ;;  %1464 = vmatmul.mubr.f32.vlgmr.msra.gmra.mrb[0].mxu1 %v640_v1  ;;  %v457_v0 = vld [vmem:[#allocation6 + $0x248] sm:$0xff] }
  0x6a   :  { %1638 = vmatpush3.bf16.msra.mxu0 %v1635_v61  ;;  %1798 = vmatpush3.bf16.msra.mxu1 %v1635_v61  ;;  %v455_v61 = vld [vmem:[#allocation6 + $0x238] sm:$0xff]  ;;  %v1715_v1 = vpack.c.bf16 %v457_v0, %v456_v63 }
  0x6b   :  { %1640 = vmatprep.subr.bf16.mxu0 %v1639_v2  ;;  %1800 = vmatprep.subr.bf16.mxu1 %v1639_v2  ;;  %v1711_v62 = vpack.c.bf16 %v455_v61, %v454_v60 }
  0x6c   :  { %1323 = vmatprep.mubr.f32.mxu0 %v2045_v11  ;;  %1498 = vmatprep.mubr.f32.mxu1 %v2048_v13  ;;  %v1655_v11 = vpack.c.bf16 %v267_v17, %v266_v16  ;;  %v268_v13 = vld [vmem:[#allocation6 + $0x160] sm:$0xff]  ;;  %v925_v16 = vld [vmem:[#allocation2 + $0x24] sm:$0xff]  ;;  %v1040_v17 = vld [vmem:[%s2081_s2] ss:$0 sm:$0xff] }
  0x6d   :  { %v1659_v19 = vpack.c.bf16 %v269_v18, %v268_v13 }
  0x6e   :  { %1642 = vmatpush3.bf16.msra.mxu0 %v1639_v2  ;;  %1802 = vmatpush3.bf16.msra.mxu1 %v1639_v2  ;;  %v458_v2 = vld [vmem:[#allocation6 + $0x250] sm:$0xff] }
  0x6f   :  { %1644 = vmatprep.subr.bf16.mxu0 %v1643_v5  ;;  %1804 = vmatprep.subr.bf16.mxu1 %v1643_v5  ;;  %v1719_v4 = vpack.c.bf16 %v459_v3, %v458_v2 }
  0x72   :  { %1646 = vmatpush3.bf16.msra.mxu0 %v1643_v5  ;;  %1806 = vmatpush3.bf16.msra.mxu1 %v1643_v5  ;;  %v460_v5 = vld [vmem:[#allocation6 + $0x260] sm:$0xff] }
  0x73   :  { %1648 = vmatprep.subr.bf16.mxu0 %v1647_v8  ;;  %1808 = vmatprep.subr.bf16.mxu1 %v1647_v8  ;;  %v1723_v7 = vpack.c.bf16 %v461_v6, %v460_v5 }
  0x76   :  { %1650 = vmatpush3.bf16.msra.mxu0 %v1647_v8  ;;  %1810 = vmatpush3.bf16.msra.mxu1 %v1647_v8  ;;  %v462_v8 = vld [vmem:[#allocation6 + $0x270] sm:$0xff] }
  0x77   :  { %1652 = vmatprep.subr.bf16.mxu0 %v1651_v12  ;;  %1812 = vmatprep.subr.bf16.mxu1 %v1651_v12  ;;  %v1727_v10 = vpack.c.bf16 %v463_v9, %v462_v8 }
  0x7a   :  { %1654 = vmatpush3.bf16.msra.mxu0 %v1651_v12  ;;  %1814 = vmatpush3.bf16.msra.mxu1 %v1651_v12  ;;  %v446_v12 = vld [vmem:[#allocation2 + $0xc] sm:$0xff] }
  0x7b   :  { %1656 = vmatprep.subr.bf16.mxu0 %v1655_v11  ;;  %1816 = vmatprep.subr.bf16.mxu1 %v1655_v11 }
  0x7e   :  { %1658 = vmatpush3.bf16.msra.mxu0 %v1655_v11  ;;  %1818 = vmatpush3.bf16.msra.mxu1 %v1655_v11 }
  0x7f   :  { %1660 = vmatprep.subr.bf16.mxu0 %v1659_v19  ;;  %1820 = vmatprep.subr.bf16.mxu1 %v1659_v19 }
  0x82   :  { %1662 = vmatpush3.bf16.msra.mxu0 %v1659_v19  ;;  %1822 = vmatpush3.bf16.msra.mxu1 %v1659_v19 }
  0x83   :  { %1664 = vmatprep.subr.bf16.mxu0 %v1663_v22  ;;  %1824 = vmatprep.subr.bf16.mxu1 %v1663_v22 }
  0x86   :  { %1666 = vmatpush3.bf16.msra.mxu0 %v1663_v22  ;;  %1826 = vmatpush3.bf16.msra.mxu1 %v1663_v22 }
  0x87   :  { %1668 = vmatprep.subr.bf16.mxu0 %v1667_v25  ;;  %1828 = vmatprep.subr.bf16.mxu1 %v1667_v25 }
  0x89   :  { %1324 = vmatmul.mubr.f32.vlgmr.msra.gmra.mrb[0].mxu0 %v2050_v14  ;;  %1499 = vmatmul.mubr.f32.vlgmr.msra.gmra.mrb[0].mxu1 %v2054_v15  ;;  %v361_v14 = vld [vmem:[#allocation6 + $0x1c8] sm:$0xff] }
  0x8a   :  { %1670 = vmatpush3.bf16.msra.mxu0 %v1667_v25  ;;  %1830 = vmatpush3.bf16.msra.mxu1 %v1667_v25  ;;  %v1683_v15 = vpack.c.bf16 %v361_v14, %v360_v37 }
  0x8b   :  { %1672 = vmatprep.subr.bf16.mxu0 %v1671_v28  ;;  %1832 = vmatprep.subr.bf16.mxu1 %v1671_v28 }
  0x8c   :  { %1358 = vmatprep.mubr.f32.mxu0 %v349_v31  ;;  %1533 = vmatprep.mubr.f32.mxu1 %v829_v32 }
  0x8e   :  { %1674 = vmatpush3.bf16.msra.mxu0 %v1671_v28  ;;  %1834 = vmatpush3.bf16.msra.mxu1 %v1671_v28 }
  0x8f   :  { %1676 = vmatprep.subr.bf16.mxu0 %v1675_v33  ;;  %1836 = vmatprep.subr.bf16.mxu1 %v1675_v33 }
  0x92   :  { %1678 = vmatpush3.bf16.msra.mxu0 %v1675_v33  ;;  %1838 = vmatpush3.bf16.msra.mxu1 %v1675_v33 }
  0x93   :  { %1680 = vmatprep.subr.bf16.mxu0 %v1679_v36  ;;  %1840 = vmatprep.subr.bf16.mxu1 %v1679_v36 }
  0x96   :  { %1682 = vmatpush3.bf16.msra.mxu0 %v1679_v36  ;;  %1842 = vmatpush3.bf16.msra.mxu1 %v1679_v36 }
  0x97   :  { %1684 = vmatprep.subr.bf16.mxu0 %v1683_v15  ;;  %1844 = vmatprep.subr.bf16.mxu1 %v1683_v15 }
  0x9a   :  { %1686 = vmatpush3.bf16.msra.mxu0 %v1683_v15  ;;  %1846 = vmatpush3.bf16.msra.mxu1 %v1683_v15 }
  0x9b   :  { %1688 = vmatprep.subr.bf16.mxu0 %v1687_v40  ;;  %1848 = vmatprep.subr.bf16.mxu1 %v1687_v40 }
  0x9e   :  { %1690 = vmatpush3.bf16.msra.mxu0 %v1687_v40  ;;  %1850 = vmatpush3.bf16.msra.mxu1 %v1687_v40 }
  0x9f   :  { %1692 = vmatprep.subr.bf16.mxu0 %v1691_v43  ;;  %1852 = vmatprep.subr.bf16.mxu1 %v1691_v43 }
  0xa2   :  { %1694 = vmatpush3.bf16.msra.mxu0 %v1691_v43  ;;  %1854 = vmatpush3.bf16.msra.mxu1 %v1691_v43 }
  0xa3   :  { %1696 = vmatprep.subr.bf16.mxu0 %v1695_v46  ;;  %1856 = vmatprep.subr.bf16.mxu1 %v1695_v46 }
  0xa6   :  { %1698 = vmatpush3.bf16.msra.mxu0 %v1695_v46  ;;  %1858 = vmatpush3.bf16.msra.mxu1 %v1695_v46 }
  0xa7   :  { %1700 = vmatprep.subr.bf16.mxu0 %v1699_v49  ;;  %1860 = vmatprep.subr.bf16.mxu1 %v1699_v49 }
  0xa9   :  { %1359 = vmatmul.mubr.f32.vlgmr.msra.gmra.mrb[0].mxu0 %v350_v52  ;;  %1534 = vmatmul.mubr.f32.vlgmr.msra.gmra.mrb[0].mxu1 %v830_v53 }
  0xaa   :  { %1702 = vmatpush3.bf16.msra.mxu0 %v1699_v49  ;;  %1862 = vmatpush3.bf16.msra.mxu1 %v1699_v49 }
  0xab   :  { %1704 = vmatprep.subr.bf16.mxu0 %v1703_v54  ;;  %1864 = vmatprep.subr.bf16.mxu1 %v1703_v54 }
  0xac   :  { %1393 = vmatprep.mubr.f32.mxu0 %v445_v57  ;;  %1568 = vmatprep.mubr.f32.mxu1 %v924_v58 }
  0xae   :  { %1706 = vmatpush3.bf16.msra.mxu0 %v1703_v54  ;;  %1866 = vmatpush3.bf16.msra.mxu1 %v1703_v54 }
  0xaf   :  { %1708 = vmatprep.subr.bf16.mxu0 %v1707_v59  ;;  %1868 = vmatprep.subr.bf16.mxu1 %v1707_v59 }
  0xb2   :  { %1710 = vmatpush3.bf16.msra.mxu0 %v1707_v59  ;;  %1870 = vmatpush3.bf16.msra.mxu1 %v1707_v59 }
  0xb3   :  { %1712 = vmatprep.subr.bf16.mxu0 %v1711_v62  ;;  %1872 = vmatprep.subr.bf16.mxu1 %v1711_v62 }
  0xb6   :  { %1714 = vmatpush3.bf16.msra.mxu0 %v1711_v62  ;;  %1874 = vmatpush3.bf16.msra.mxu1 %v1711_v62 }
  0xb7   :  { %1716 = vmatprep.subr.bf16.mxu0 %v1715_v1  ;;  %1876 = vmatprep.subr.bf16.mxu1 %v1715_v1 }
  0xba   :  { %1718 = vmatpush3.bf16.msra.mxu0 %v1715_v1  ;;  %1878 = vmatpush3.bf16.msra.mxu1 %v1715_v1 }
  0xbb   :  { %1720 = vmatprep.subr.bf16.mxu0 %v1719_v4  ;;  %1880 = vmatprep.subr.bf16.mxu1 %v1719_v4 }
  0xbe   :  { %1722 = vmatpush3.bf16.msra.mxu0 %v1719_v4  ;;  %1882 = vmatpush3.bf16.msra.mxu1 %v1719_v4 }
  0xbf   :  { %1724 = vmatprep.subr.bf16.mxu0 %v1723_v7  ;;  %1884 = vmatprep.subr.bf16.mxu1 %v1723_v7 }
  0xc2   :  { %1726 = vmatpush3.bf16.msra.mxu0 %v1723_v7  ;;  %1886 = vmatpush3.bf16.msra.mxu1 %v1723_v7 }
  0xc3   :  { %1728 = vmatprep.subr.bf16.mxu0 %v1727_v10  ;;  %1888 = vmatprep.subr.bf16.mxu1 %v1727_v10 }
  0xc6   :  { %1730 = vmatpush3.bf16.msra.mxu0 %v1727_v10  ;;  %1890 = vmatpush3.bf16.msra.mxu1 %v1727_v10 }
  0xc9   :  { %1394 = vmatmul.mubr.f32.vlgmr.msra.gmra.mrb[0].mxu0 %v446_v12  ;;  %1569 = vmatmul.mubr.f32.vlgmr.msra.gmra.mrb[0].mxu1 %v925_v16 }
 0x19c   :  { %v1395_v11 = vpop.f32.mrb[0].mxu0  ;;  %v1570_v13 = vpop.f32.mrb[0].mxu1 }
 0x19d   :  { %v1891_v18 = vadd.f32 %v1395_v11, %v1040_v17  ;;  %v1893_v19 = vadd.f32 %v1570_v13, %v1040_v17  ;;  %v530_v20 = vpop.f32.mrb[1].mxu0  ;;  %v1008_v21 = vpop.f32.mrb[1].mxu1 }
 0x19e   :  { %v1892_v22 = vadd.f32 %v1040_v17, %v530_v20  ;;  %v1894_v23 = vadd.f32 %v1040_v17, %v1008_v21 }
 0x19f   :  { %542 = vst [vmem:[#allocation8 + $0x8] sm:$0xff] %v1891_v18  ;;  %1021 = vst [vmem:[#allocation8 + $0x18] sm:$0xff] %v1893_v19 }
 0x1a0   :  { %541 = vst [vmem:[#allocation8] sm:$0xff] %v1892_v22  ;;  %1020 = vst [vmem:[#allocation8 + $0x10] sm:$0xff] %v1894_v23 }
 0x1a1   :  { %1972 = shalt.err (!%p1969_p6)
}
 0x1a2   :  { %s1973_s15 = scalar_lea.hbm %s2082_s3, 512 }
 0x1a3   :  { %p1974_p7 = scmp.ne.s32.totalorder %s2082_s3, %s1973_s15  ;;  %p1977_p8 = scmp.lt.u32.totalorder %s1973_s15, %s2082_s3 }
 0x1a5   :  { %p1979_p9 = pnand %p1977_p8, %p1974_p7 }
 0x1a7   :  { %1982 = shalt.err (!%p1979_p9)
}
 0x1a8   :  { %1033 = dma.vmem_to_hbm [thread:$0]  %s1028_s12, 512, %s2082_s3, [#allocation5], %s1990_s22, %s1990_s22, %s1991_s23  }
 0x1a9   :  { %1987 = dma.done.wait [#allocation5], 512  }
 0x1aa   :  { %1988 = vsyncadd [#allocation5], 4294966784 }
 0x1ab   :  { %1037 = vsyncpa [#allocation4], 1 }
 0x1ac   :  { %1038 = vsyncpa [#allocation7], 1 }
 0x1ad   :  { %1039 = vsyncpa [#allocation5], 1 }

</bundles_post_ra>
